<compile_context>
chip_gen: v6e
topology: v6e:2x2x1
jax: 0.10.0
libtpu: 0.0.40
codegen_flags: <defaults>
</compile_context>

<pallas_src>
import jax
import jax.numpy as jnp
from jax import lax
from jax.experimental import pallas as pl
from jax.experimental.pallas import tpu as pltpu

IN_FEATURES = 784
OUT_FEATURES = 10

_LANE = 128
_SUBLANE = 8
_F32_BYTES = 4


def _round_up(n: int, m: int) -> int:
    return ((n + m - 1) // m) * m


def _default_tile_b() -> int:
    """Per-generation batch tile (amortize per-grid-step overhead vs HBM BW)."""
    try:
        kind = jax.devices()[0].device_kind.lower()
    except Exception:
        return 1024
    if "v7" in kind:
        return 4096   # ~3.2 TB/s HBM: big tiles; needs raised scoped-VMEM limit
    if "v6" in kind:
        return 2048   # fits v6e's 32 MiB default scoped VMEM
    return 1024       # v5e & older: fits the 16 MiB default scoped VMEM


def _pick_tile_b(batch: int, tile_b: int) -> int:
    tb = max(_SUBLANE, min(_round_up(tile_b, _SUBLANE), _round_up(batch, _SUBLANE)))
    # v7x megacore: keep >= 2 grid steps on large batches so both TensorCores
    # get a share of the "parallel" batch axis (neutral on single-TC v5e/v6e).
    if batch >= 1024 and pl.cdiv(batch, tb) < 2:
        tb = max(_SUBLANE, _round_up(pl.cdiv(batch, 2), _SUBLANE))
    return tb


def _vmem_limit_bytes(tb: int) -> int:
    # Lane-padded VMEM footprint: x block is stored as (tb, 896) and the output
    # block as (tb, 128); both are double-buffered by the Pallas pipeline.
    lanes_x = _round_up(IN_FEATURES, _LANE)    # 896
    lanes_o = _round_up(OUT_FEATURES, _LANE)   # 128
    need = 2 * tb * (lanes_x + lanes_o) * _F32_BYTES
    need += 2 * _round_up(OUT_FEATURES, _SUBLANE) * lanes_x * _F32_BYTES  # weight
    need += 2 * _SUBLANE * lanes_o * _F32_BYTES                           # bias
    # >= 32 MiB is safe on every generation (physical VMEM >= 64 MiB); cap below
    # v7x's 64 MiB physical VMEM, leaving headroom for compiler scratch.
    return int(min(max(need + (8 << 20), 32 << 20), 56 << 20))


def linear_kernel(x_ref, w_ref, b_ref, o_ref):
    # x_ref: (TB, 784)  w_ref: (10, 784)  b_ref: (1, 10)  o_ref: (TB, 10)
    acc = lax.dot_general(
        x_ref[...],
        w_ref[...],
        dimension_numbers=(((1,), (1,)), ((), ())),  # contract feature dims -> x @ W.T
        preferred_element_type=jnp.float32,
    )
    o_ref[...] = (acc + b_ref[...]).astype(o_ref.dtype)


def teacher_model_forward(x, w, b, *, tile_b=None):
    """nn.Linear(784, 10): x (B, 784); w (10, 784) PyTorch layout; b (10,)."""
    B = x.shape[0]
    tb = _pick_tile_b(B, tile_b if tile_b is not None else _default_tile_b())

    # Optional bf16-activation path (halves the HBM read traffic on x): keep
    # W/b in the activation dtype; the MXU still accumulates in f32.
    if w.dtype != x.dtype:
        w = w.astype(x.dtype)
        b = b.astype(x.dtype)
    b2 = b.reshape(1, OUT_FEATURES)

    grid = (pl.cdiv(B, tb),)

    return pl.pallas_call(
        linear_kernel,
        out_shape=jax.ShapeDtypeStruct((B, OUT_FEATURES), x.dtype),
        grid_spec=pltpu.PrefetchScalarGridSpec(
            num_scalar_prefetch=0,
            grid=grid,
            in_specs=[
                # x: tiled over the batch axis (double-buffered by Pallas).
                pl.BlockSpec((tb, IN_FEATURES), lambda i: (i, 0)),
                # weight: full (10, 784) block, resident across all grid steps.
                pl.BlockSpec((OUT_FEATURES, IN_FEATURES), lambda i: (0, 0)),
                # bias: full (1, 10) block, resident across all grid steps.
                pl.BlockSpec((1, OUT_FEATURES), lambda i: (0, 0)),
            ],
            out_specs=pl.BlockSpec((tb, OUT_FEATURES), lambda i: (i, 0)),
        ),
        compiler_params=pltpu.CompilerParams(
            # Independent batch tiles -> parallel (lets v7x shard across 2 TCs).
            dimension_semantics=("parallel",),
            vmem_limit_bytes=_vmem_limit_bytes(tb),
        ),
    )(x, w, b2)


if __name__ == "__main__":
    key = jax.random.PRNGKey(0)
    kw, kb, k1, k2, k3 = jax.random.split(key, 5)

    # Deterministic params (PyTorch nn.Linear default: U(-k, k), k = 1/sqrt(fan_in)).
    bound = 1.0 / (IN_FEATURES ** 0.5)
    w = jax.random.uniform(kw, (OUT_FEATURES, IN_FEATURES),
                           minval=-bound, maxval=bound, dtype=jnp.float32)
    b = jax.random.uniform(kb, (OUT_FEATURES,),
                           minval=-bound, maxval=bound, dtype=jnp.float32)

    def check(x):
        out = jax.block_until_ready(teacher_model_forward(x, w, b))
        ref = x @ w.T + b
        assert out.shape == ref.shape
        assert jnp.allclose(out, ref, atol=1e-4, rtol=1e-4), \
            float(jnp.max(jnp.abs(out - ref)))

    # Case 1: sublane-aligned small batch (single full block).
    check(jax.random.normal(k1, (8, IN_FEATURES), dtype=jnp.float32))
    # Case 2: ragged batch -> masked boundary block (no wrapper-side padding).
    check(jax.random.normal(k2, (20, IN_FEATURES), dtype=jnp.float32))
    # Case 3: multi-step grid + ragged tail (+ >=2-step megacore split path).
    check(jax.random.normal(k3, (1050, IN_FEATURES), dtype=jnp.float32))

    print("KERNEL_OK")
</pallas_src>

<mosaic_0001>
module attributes {stable_mosaic.version = 11 : i64} {
  func.func @linear_kernel(%arg0: i32, %arg1: memref<8x784xf32, #tpu.memory_space<vmem>>, %arg2: memref<10x784xf32, #tpu.memory_space<vmem>>, %arg3: memref<1x10xf32, #tpu.memory_space<vmem>>, %arg4: memref<8x10xf32, #tpu.memory_space<vmem>>) attributes {dimension_semantics = [#tpu.dimension_semantics<parallel>], iteration_bounds = array<i64: 1>, scalar_prefetch = 0 : i64, scratch_operands = 0 : i64, tpu.core_type = #tpu.core_type<tc>, window_params = [{transform_indices = @transform_0, window_bounds = array<i64: 8, 784>}, {pipeline_mode = #tpu.pipeline_mode<synchronous>, transform_indices = @transform_1, window_bounds = array<i64: 10, 784>}, {pipeline_mode = #tpu.pipeline_mode<synchronous>, transform_indices = @transform_2, window_bounds = array<i64: 1, 10>}, {transform_indices = @transform_3, window_bounds = array<i64: 8, 10>}]} {
    %c0 = arith.constant 0 : index
    %c0_0 = arith.constant 0 : index
    %0 = vector.load %arg1[%c0, %c0_0] : memref<8x784xf32, #tpu.memory_space<vmem>>, vector<8x784xf32>
    %c0_1 = arith.constant 0 : index
    %c0_2 = arith.constant 0 : index
    %1 = vector.load %arg2[%c0_1, %c0_2] : memref<10x784xf32, #tpu.memory_space<vmem>>, vector<10x784xf32>
    %cst = arith.constant dense<0.000000e+00> : vector<8x10xf32>
    %2 = tpu.matmul %0, %1, %cst {dimension_numbers = #tpu.dot_dimension_numbers<[1], [1], [0], [0], [0, 0, 1, 0], [], []>} : vector<8x784xf32>, vector<10x784xf32>, vector<8x10xf32> -> vector<8x10xf32>
    %c0_3 = arith.constant 0 : index
    %c0_4 = arith.constant 0 : index
    %3 = vector.load %arg3[%c0_3, %c0_4] : memref<1x10xf32, #tpu.memory_space<vmem>>, vector<1x10xf32>
    %4 = vector.broadcast %3 : vector<1x10xf32> to vector<8x10xf32>
    %5 = arith.addf %2, %4 : vector<8x10xf32>
    %c0_5 = arith.constant 0 : index
    %c0_6 = arith.constant 0 : index
    %6 = vector.load %arg4[%c0_5, %c0_6] : memref<8x10xf32, #tpu.memory_space<vmem>>, vector<8x10xf32>
    tpu.vector_store %arg4[%c0_5, %c0_6], %5 {strides = array<i32>} : memref<8x10xf32, #tpu.memory_space<vmem>>, vector<8x10xf32>,
    return
  }
  func.func @transform_0(%arg0: i32) -> (i32, i32) {
    %c0_i32 = arith.constant 0 : i32
    %c0_i32_0 = arith.constant 0 : i32
    return %arg0, %c0_i32 : i32, i32
  }
  func.func @transform_1(%arg0: i32) -> (i32, i32) {
    %c0_i32 = arith.constant 0 : i32
    %c0_i32_0 = arith.constant 0 : i32
    %c0_i32_1 = arith.constant 0 : i32
    return %c0_i32, %c0_i32_0 : i32, i32
  }
  func.func @transform_2(%arg0: i32) -> (i32, i32) {
    %c0_i32 = arith.constant 0 : i32
    %c0_i32_0 = arith.constant 0 : i32
    %c0_i32_1 = arith.constant 0 : i32
    return %c0_i32, %c0_i32_0 : i32, i32
  }
  func.func @transform_3(%arg0: i32) -> (i32, i32) {
    %c0_i32 = arith.constant 0 : i32
    %c0_i32_0 = arith.constant 0 : i32
    return %arg0, %c0_i32 : i32, i32
  }
}

</mosaic_0001>

<bundles_post_ra>
// kernel: tpu_custom_call.1
= control target key start
LH: loop header
LB: loop body
LE: loop exit
PB: predicated region body
PF: predicated region fallthrough
CT: control target
= control target key end

     0   :  { %8 = vsyncpa [#allocation3], 0  ;;  %s506_s0 = inlined_call_operand.hbm [shape: f32[8,784], index: 0, kind: input, shape index: {}]   ;;  %s507_s1 = inlined_call_operand.hbm [shape: f32[10,784], index: 1, kind: input, shape index: {}]   ;;  %s508_s2 = inlined_call_operand.vmem [shape: f32[1,10], index: 2, kind: input, shape index: {}]   ;;  %s509_s3 = inlined_call_operand.hbm [shape: f32[8,10], index: 3, kind: output, shape index: {}]  }
   0x1   :  { %9 = vsyncpa [#allocation6], 0 }
   0x2   :  { %10 = vsyncpa [#allocation4], 0  ;;  %s464_s12 = smov [#allocation2]   ;;  %s465_s14 = smov [#allocation5]  }
   0x3   :  { %s17_s13 = sshll.u32 %s464_s12, 4  ;;  %s26_s15 = sshll.u32 %s465_s14, 4  ;;  %s18_s13 = int_to_ptr.vmem [resolvable:$true] %s17_s13  ;;  %s27_s15 = int_to_ptr.vmem [resolvable:$true] %s26_s15 }
   0x4   :  { %s406_s16 = scalar_lea.vmem %s18_s13, 896  ;;  %p411_p1 = scmp.lt.s32.totalorder %s18_s13, %s18_s13 }
   0x5   :  { %p407_p0 = scmp.ne.s32.totalorder %s18_s13, %s406_s16  ;;  %p412_p2 = scmp.lt.s32.totalorder %s406_s16, %s406_s16 }
   0x7   :  { %p413_p3 = por %p412_p2, %p411_p1 }
   0x9   :  { %p414_p4 = pnand %p413_p3, %p407_p0 }
   0xb   :  { %417 = shalt.err (!%p414_p4)
}
   0xc   :  { %20 = dma.hbm_to_vmem [thread:$0]  %s506_s0, 896, %s18_s13, [#allocation3]  }
   0xd   :  { %s426_s19 = scalar_lea.vmem %s27_s15, 1792  ;;  %p431_p6 = scmp.lt.s32.totalorder %s27_s15, %s27_s15 }
   0xe   :  { %p427_p5 = scmp.ne.s32.totalorder %s27_s15, %s426_s19  ;;  %p432_p7 = scmp.lt.s32.totalorder %s426_s19, %s426_s19 }
  0x10   :  { %p433_p8 = por %p432_p7, %p431_p6 }
  0x12   :  { %p434_p9 = pnand %p433_p8, %p427_p5 }
  0x14   :  { %437 = shalt.err (!%p434_p9)
}
  0x15   :  { %s466_s20 = smov 896   ;;  %s467_s21 = smov 56  }
  0x16   :  { %32 = dma.hbm_to_vmem [thread:$0]  %s507_s1, 1792, %s27_s15, [#allocation6], %s466_s20, %s466_s20, %s467_s21  }
  0x17   :  { %458 = dma.done.wait [#allocation3], 896  }
  0x18   :  { %459 = vsyncadd [#allocation3], 4294966400 }
  0x19   :  { %460 = dma.done.wait [#allocation6], 1792  }
  0x1a   :  { %461 = vsyncadd [#allocation6], 4294965504  ;;  %v56_v0 = vld [vmem:[#allocation5 + $0x40] sm:$0x3]  ;;  %v58_v1 = vld [vmem:[#allocation5 + $0x50] sm:$0x3] }
  0x1b   :  { %v55_v2 = vld [vmem:[#allocation5 + $0x38] sm:$0x3]  ;;  %107 = vmatprep.subr.mxu0 %v56_v0  ;;  %177 = vmatprep.subr.mxu1 %v58_v1  ;;  %v57_v3 = vld [vmem:[#allocation5 + $0x48] sm:$0x3]  ;;  %v42_v6 = vld [vmem:[#allocation2 + $0x8] sm:$0xff]  ;;  %v468_v13 = vmov 0.0  }
  0x1c   :  { %v49_v4 = vld [vmem:[#allocation5 + $0x8] sm:$0xff]  ;;  %v51_v5 = vld [vmem:[#allocation5 + $0x18] sm:$0xff]  ;;  %108 = vmatpush1.xpose.msra.mxu0 %v55_v2  ;;  %178 = vmatpush1.xpose.msra.mxu1 %v57_v3  ;;  %v48_v7 = vld [vmem:[#allocation5] sm:$0xff]  ;;  %vm69_vm0 = vcmask 130048   ;;  %vm469_vm1 = vmmov 0   ;;  %s470_s24 = smov [#allocation7]  }
  0x1d   :  { %109 = vmatprep.subr.mxu0 %v49_v4  ;;  %179 = vmatprep.subr.mxu1 %v51_v5  ;;  %v50_v8 = vld [vmem:[#allocation5 + $0x10] sm:$0xff]  ;;  %v44_v9 = vld [vmem:[#allocation2 + $0x18] sm:$0xff]  ;;  %v41_v11 = vld [vmem:[#allocation2] sm:$0xff]  ;;  %s367_s25 = sshll.u32 %s470_s24, 4  ;;  %vm359_vm2 = vcmask 80896   ;;  %s368_s25 = int_to_ptr.vmem [resolvable:$true] %s367_s25 }
  0x1e   :  { %143 = vmatprep.mubr.f32.mxu0 %v42_v6  ;;  %213 = vmatprep.mubr.f32.mxu1 %v44_v9  ;;  %v60_v10 = vld [vmem:[#allocation5 + $0x60] sm:$0x3]  ;;  %v43_v12 = vld [vmem:[#allocation2 + $0x10] sm:$0xff]  ;;  %v61_v15 = vld [vmem:[#allocation5 + $0x68] sm:$0x3]  ;;  %s438_s26 = scalar_lea.vmem %s368_s25, 128  ;;  %p443_p11 = scmp.lt.s32.totalorder %s368_s25, %s368_s25 }
  0x1f   :  { %v59_v14 = vld [vmem:[#allocation5 + $0x58] sm:$0x3]  ;;  %v53_v16 = vld [vmem:[#allocation5 + $0x28] sm:$0xff]  ;;  %v46_v17 = vld [vmem:[#allocation2 + $0x28] sm:$0xff]  ;;  %p439_p10 = scmp.ne.s32.totalorder %s368_s25, %s438_s26  ;;  %p444_p12 = scmp.lt.s32.totalorder %s438_s26, %s438_s26 }
  0x20   :  { %110 = vmatpush1.xpose.msra.mxu0 %v48_v7  ;;  %180 = vmatpush1.xpose.msra.mxu1 %v50_v8  ;;  %v52_v18 = vld [vmem:[#allocation5 + $0x20] sm:$0xff]  ;;  %v54_v19 = vld [vmem:[#allocation5 + $0x30] sm:$0xff]  ;;  %v45_v20 = vld [vmem:[#allocation2 + $0x20] sm:$0xff] }
  0x21   :  { %247 = vmatprep.subr.mxu0 %v60_v10  ;;  %384 = vmatprep.subr.mxu1 %v468_v13  ;;  %v47_v21 = vld [vmem:[#allocation2 + $0x30] sm:$0xff]  ;;  %v377_v22 = vld [vmem:[%s508_s2] ss:$0 sm:$0xff]  ;;  %p445_p13 = por %p444_p12, %p443_p11 }
  0x23   :  { %144 = vmatmul.mubr.f32.vlgmr.msra.gmra.mxu0 %v41_v11  ;;  %214 = vmatmul.mubr.f32.vlgmr.msra.gmra.mxu1 %v43_v12  ;;  %p446_p0 = pnand %p445_p13, %p439_p10 }
  0x24   :  { %248 = vmatpush1.xpose.msra.mxu0 %v59_v14  ;;  %385 = vmatpush3.xpose.msk.msra.mxu1 %vm69_vm0, %v61_v15 }
  0x25   :  { %249 = vmatprep.subr.mxu0 %v53_v16  ;;  %386 = vmatprep.subr.mxu1 %v468_v13 }
  0x26   :  { %283 = vmatprep.mubr.f32.mxu0 %v46_v17  ;;  %388 = vmatprep.mubr.msk.f32.mxu1 %vm469_vm1, %v468_v13 }
  0x28   :  { %250 = vmatpush1.xpose.msra.mxu0 %v52_v18  ;;  %387 = vmatpush3.xpose.msk.msra.mxu1 %vm69_vm0, %v54_v19 }
  0x2b   :  { %284 = vmatmul.mubr.f32.vlgmr.msra.gmra.mxu0 %v45_v20  ;;  %389 = vmatmul.mubr.msk.f32.vlgmr.msra.gmra.mxu1 %vm69_vm0, %v47_v21 }
  0xe3   :  { %v145_v23 = vpop.f32.mrf.mxu0  ;;  %v215_v24 = vpop.f32.mrf.mxu1 }
  0xe4   :  { %v146_v27 = vadd.f32 %v377_v22, %v145_v23 }
  0xe5   :  { %v147_v25 = vpop.f32.mrf.mxu0  ;;  %v217_v26 = vpop.f32.mrf.mxu1 }
  0xe6   :  { %v216_v28 = vadd.f32 %v215_v24, %v146_v27 }
  0xeb   :  { %v285_v29 = vpop.f32.mrf.mxu0  ;;  %v355_v30 = vpop.f32.mrf.mxu1 }
  0xec   :  { %v286_v31 = vadd.f32 %v285_v29, %v216_v28 }
  0xed   :  { %v287_v32 = vpop.f32.mrf.mxu0  ;;  %v390_v33 = vpop.f32.mrf.mxu1 }
  0xee   :  { %v356_v34 = vadd.f32 %v355_v30, %v286_v31 }
  0xf0   :  { %360 = vst.msk [vmem:[#allocation7] sm:$0xff] %vm359_vm2, %v356_v34 }
  0xf1   :  { %449 = shalt.err (!%p446_p0)
}
  0xf2   :  { %370 = dma.vmem_to_hbm [thread:$0]  %s368_s25, 128, %s509_s3, [#allocation4]  }
  0xf3   :  { %462 = dma.done.wait [#allocation4], 128  }
  0xf4   :  { %463 = vsyncadd [#allocation4], 4294967168 }
  0xf5   :  { %374 = vsyncpa [#allocation3], 1 }
  0xf6   :  { %375 = vsyncpa [#allocation6], 1 }
  0xf7   :  { %376 = vsyncpa [#allocation4], 1 }

</bundles_post_ra>
